<compile_context>
chip_gen: v5e
topology: v5e:2x2
jax: 0.10.0
libtpu: 0.0.40
codegen_flags: <defaults>
</compile_context>

<pallas_src>
import jax
import jax.numpy as jnp
from jax.experimental import pallas as pl
from jax.experimental.pallas import tpu as pltpu


def _weak_augment_kernel(r_ref, ck_ref, x_ref, o_ref):
    # x_ref: (nb, H, C*W) lane-dense slab; r_ref: (H, H); ck_ref: (C*W, C*W).
    r = r_ref[...]
    ck = ck_ref[...]
    nb = x_ref.shape[0]
    for b in range(nb):  # static unroll; nb is small (<= 8)
        xb = x_ref[b]  # (H, C*W), native dtype (no f32 upcast)
        # hflip + TranslateX: per-channel column gather via block-diag kron(I_C, Cmat).
        y = jnp.dot(xb, ck, preferred_element_type=jnp.float32).astype(xb.dtype)
        # TranslateY: row gather (same transform for every channel / lane).
        out = jnp.dot(r, y, preferred_element_type=jnp.float32)
        o_ref[b] = out.astype(o_ref.dtype)


def _pick_batch_block(n, bytes_per_image, vmem_budget=8 * 1024 * 1024, max_nb=8):
    """Images per grid step: 2x in + 2x out image blocks must fit the budget."""
    nb = max(1, min(n, max_nb, vmem_budget // max(1, 4 * bytes_per_image)))
    while n % nb:
        nb -= 1
    # Prefer an even grid length so both v7x TensorCores get work.
    if (n // nb) % 2 != 0 and nb % 2 == 0:
        nb //= 2
    return nb


def weak_augment(img, key):
    """img: float array of shape (N, C, H, W). Returns (augmented image, params)."""
    N, C, H, W = img.shape
    dt = img.dtype
    k1, k2, k3 = jax.random.split(key, 3)

    # ('HorizontalFlip', prob=0.5): apply iff rand < 0.5
    flip = (jax.random.uniform(k1) < 0.5).astype(jnp.int32)
    # ('TranslateX', prob=1.0, 0.125*W): magnitude = 0.125*W*rand, int() truncation
    tx = jnp.floor(0.125 * W * jax.random.uniform(k2)).astype(jnp.int32)
    # ('TranslateY', prob=1.0, 0.125*H)
    ty = jnp.floor(0.125 * H * jax.random.uniform(k3)).astype(jnp.int32)

    # ---- Selection matrices, built once per call, in the image dtype --------
    # Columns (within a channel): out[:, j] = x[:, flip ? W-1-(j-tx) : j-tx], zero fill.
    j = jnp.arange(W, dtype=jnp.int32)
    shifted = j - tx
    src_col = jnp.where(flip > 0, (W - 1) - shifted, shifted)
    col_valid = (shifted >= 0) & (shifted < W)
    cmat = (
        (jnp.arange(W, dtype=jnp.int32)[:, None] == src_col[None, :])
        & col_valid[None, :]
    ).astype(dt)                                    # (W, W)
    # Same column transform for every channel; channels live on the lane axis,
    # so the (small) block-diagonal now sits on the cheap C*W side.
    ckron = jnp.kron(jnp.eye(C, dtype=dt), cmat)    # (C*W, C*W)

    # Rows: out[i, :] = x[i - ty, :], zero fill. Applied from the left, per channel.
    i = jnp.arange(H, dtype=jnp.int32)
    src_row = i - ty
    row_valid = (src_row >= 0) & (src_row < H)
    rmat = (
        (src_row[:, None] == jnp.arange(H, dtype=jnp.int32)[None, :])
        & row_valid[:, None]
    ).astype(dt)                                    # (H, H)

    # Lane-dense slab: (N, H, C*W) with lane index = c*W + w.
    CW = C * W
    x_lane = jnp.transpose(img, (0, 2, 1, 3)).reshape(N, H, CW)

    nb = _pick_batch_block(N, H * CW * img.dtype.itemsize)

    out_lane = pl.pallas_call(
        _weak_augment_kernel,
        out_shape=jax.ShapeDtypeStruct((N, H, CW), dt),
        grid=(N // nb,),
        in_specs=[
            # Constant index_map -> selection matrices stay VMEM-resident
            # across the whole grid (DMA'd once, never rebuilt per step).
            # TODO(synk): single-buffer them (pipeline_mode=pl.Buffered(1)) to
            # reclaim their second buffer on v7x's 64 MiB VMEM.
            pl.BlockSpec((H, H), lambda n: (0, 0)),
            pl.BlockSpec((CW, CW), lambda n: (0, 0)),
            pl.BlockSpec((nb, H, CW), lambda n: (n, 0, 0)),
        ],
        out_specs=pl.BlockSpec((nb, H, CW), lambda n: (n, 0, 0)),
        compiler_params=pltpu.CompilerParams(
            dimension_semantics=("parallel",),
            vmem_limit_bytes=32 * 1024 * 1024,
        ),
    )(rmat, ckron, x_lane)

    # TODO(synk): for very large images, switch to a pltpu.roll + mask
    # formulation (pure data movement, native dtype) to reach the v7x HBM roofline.

    out = out_lane.reshape(N, H, C, W).transpose(0, 2, 1, 3)
    params = jnp.stack([flip, tx, ty]).astype(jnp.int32)
    return out, params


def _reference(img, flip, tx, ty):
    """Pure-JAX reference of flip -> translateX -> translateY with zero fill."""
    N, C, H, W = img.shape
    jcol = jnp.arange(W)
    shifted = jcol - tx
    src_col = jnp.where(flip > 0, (W - 1) - shifted, shifted)
    col_valid = (shifted >= 0) & (shifted < W)
    irow = jnp.arange(H)
    src_row = irow - ty
    row_valid = (src_row >= 0) & (src_row < H)
    g = img[:, :, jnp.clip(src_row, 0, H - 1), :][:, :, :, jnp.clip(src_col, 0, W - 1)]
    mask = (row_valid[:, None] & col_valid[None, :])[None, None]
    return jnp.where(mask, g, jnp.zeros_like(g))


if __name__ == "__main__":
    key = jax.random.PRNGKey(0)
    k_img, k_aug = jax.random.split(key)

    N, C, H, W = 2, 4, 16, 16
    img = jax.random.uniform(k_img, (N, C, H, W), dtype=jnp.float32)

    out, params = weak_augment(img, k_aug)
    out = jax.block_until_ready(out)

    ref = _reference(img, params[0], params[1], params[2])
    assert out.shape == img.shape and out.dtype == img.dtype
    assert jnp.allclose(out, ref, atol=1e-6), "mismatch vs pure-JAX reference"

    print("KERNEL_OK")
</pallas_src>

<mosaic_0001>
module attributes {stable_mosaic.version = 11 : i64} {
  func.func @_weak_augment_kernel(%arg0: i32, %arg1: memref<16x16xf32, #tpu.memory_space<vmem>>, %arg2: memref<64x64xf32, #tpu.memory_space<vmem>>, %arg3: memref<1x16x64xf32, #tpu.memory_space<vmem>>, %arg4: memref<1x16x64xf32, #tpu.memory_space<vmem>>) attributes {dimension_semantics = [#tpu.dimension_semantics<parallel>], iteration_bounds = array<i64: 2>, scalar_prefetch = 0 : i64, scratch_operands = 0 : i64, tpu.core_type = #tpu.core_type<tc>, window_params = [{pipeline_mode = #tpu.pipeline_mode<synchronous>, transform_indices = @transform_0, window_bounds = array<i64: 16, 16>}, {pipeline_mode = #tpu.pipeline_mode<synchronous>, transform_indices = @transform_1, window_bounds = array<i64: 64, 64>}, {transform_indices = @transform_2, window_bounds = array<i64: 1, 16, 64>}, {transform_indices = @transform_3, window_bounds = array<i64: 1, 16, 64>}]} {
    %c0 = arith.constant 0 : index
    %c0_0 = arith.constant 0 : index
    %0 = vector.load %arg1[%c0, %c0_0] : memref<16x16xf32, #tpu.memory_space<vmem>>, vector<16x16xf32>
    %c0_1 = arith.constant 0 : index
    %c0_2 = arith.constant 0 : index
    %1 = vector.load %arg2[%c0_1, %c0_2] : memref<64x64xf32, #tpu.memory_space<vmem>>, vector<64x64xf32>
    %c0_3 = arith.constant 0 : index
    %c0_4 = arith.constant 0 : index
    %c0_5 = arith.constant 0 : index
    %2 = vector.load %arg3[%c0_3, %c0_4, %c0_5] : memref<1x16x64xf32, #tpu.memory_space<vmem>>, vector<1x16x64xf32>
    %3 = vector.shape_cast %2 : vector<1x16x64xf32> to vector<16x64xf32>
    %cst = arith.constant dense<0.000000e+00> : vector<16x64xf32>
    %4 = tpu.matmul %3, %1, %cst {dimension_numbers = #tpu.dot_dimension_numbers<[1], [0], [0], [1], [0, 0, 1, 1], [], []>} : vector<16x64xf32>, vector<64x64xf32>, vector<16x64xf32> -> vector<16x64xf32>
    %cst_6 = arith.constant dense<0.000000e+00> : vector<16x64xf32>
    %5 = tpu.matmul %0, %4, %cst_6 {dimension_numbers = #tpu.dot_dimension_numbers<[1], [0], [0], [1], [0, 0, 1, 1], [], []>} : vector<16x16xf32>, vector<16x64xf32>, vector<16x64xf32> -> vector<16x64xf32>
    %c0_7 = arith.constant 0 : index
    %c0_8 = arith.constant 0 : index
    %c0_9 = arith.constant 0 : index
    %6 = vector.load %arg4[%c0_7, %c0_8, %c0_9] : memref<1x16x64xf32, #tpu.memory_space<vmem>>, vector<1x16x64xf32>
    %7 = vector.shape_cast %6 : vector<1x16x64xf32> to vector<16x64xf32>
    %8 = vector.shape_cast %5 : vector<16x64xf32> to vector<1x16x64xf32>
    tpu.vector_store %arg4[%c0_7, %c0_8, %c0_9], %8 {strides = array<i32>} : memref<1x16x64xf32, #tpu.memory_space<vmem>>, vector<1x16x64xf32>,
    return
  }
  func.func @transform_0(%arg0: i32) -> (i32, i32) {
    %c0_i32 = arith.constant 0 : i32
    %c0_i32_0 = arith.constant 0 : i32
    %c0_i32_1 = arith.constant 0 : i32
    return %c0_i32, %c0_i32_0 : i32, i32
  }
  func.func @transform_1(%arg0: i32) -> (i32, i32) {
    %c0_i32 = arith.constant 0 : i32
    %c0_i32_0 = arith.constant 0 : i32
    %c0_i32_1 = arith.constant 0 : i32
    return %c0_i32, %c0_i32_0 : i32, i32
  }
  func.func @transform_2(%arg0: i32) -> (i32, i32, i32) {
    %c0_i32 = arith.constant 0 : i32
    %c0_i32_0 = arith.constant 0 : i32
    %c0_i32_1 = arith.constant 0 : i32
    return %arg0, %c0_i32, %c0_i32_0 : i32, i32, i32
  }
  func.func @transform_3(%arg0: i32) -> (i32, i32, i32) {
    %c0_i32 = arith.constant 0 : i32
    %c0_i32_0 = arith.constant 0 : i32
    %c0_i32_1 = arith.constant 0 : i32
    return %arg0, %c0_i32, %c0_i32_0 : i32, i32, i32
  }
}

</mosaic_0001>

<bundles_post_ra>
// kernel: tpu_custom_call.1
= control target key start
LH: loop header
LB: loop body
LE: loop exit
PB: predicated region body
PF: predicated region fallthrough
CT: control target
= control target key end

     0   :  { %8 = vsyncpa [#allocation3], 0  ;;  %s862_s0 = inlined_call_operand.hbm [shape: f32[16,16], index: 0, kind: input, shape index: {}]   ;;  %s863_s1 = inlined_call_operand.hbm [shape: f32[64,64], index: 1, kind: input, shape index: {}]   ;;  %s864_s2 = inlined_call_operand.hbm [shape: f32[2,16,64], index: 2, kind: input, shape index: {}]   ;;  %s865_s3 = inlined_call_operand.hbm [shape: f32[2,16,64], index: 3, kind: output, shape index: {}]  }
   0x1   :  { %9 = vsyncpa [#allocation6], 0 }
   0x2   :  { %10 = vsyncpa [#allocation4], 0 }
   0x3   :  { %12 = vsyncpa [#allocation4 + $0x1], 0  ;;  %s699_s12 = smov 0   ;;  %s701_s13 = smov 0  }
   0x4   :  { %s703_s14 = smov 0   ;;  %s705_s15 = smov 0  }
   0x5 LB: > { %s720_s16 = sadd.s32 4294967295, %s671_s15   ;;  %s404_s17 = sadd.s32 4294967294, %s671_s15   ;;  %s671_s15 = sphi %s705_s15, %s875_s15   ;;  %s667_s14 = sphi %s703_s14, %s874_s14   ;;  %s663_s13 = sphi %s701_s13, %s873_s13   ;;  %s659_s12 = sphi %s699_s12, %s872_s12  }
   0x6   : > { %p80_p0 = scmp.ne.s32.totalorder %s663_s13, %s659_s12  ;;  %p81_p1 = scmp.eq.s32.totalorder %s720_s16, 0 }
   0x7   : > { %p104_p2 = scmp.eq.s32.totalorder %s720_s16, 1  ;;  %p110_p3 = scmp.eq.s32.totalorder %s404_s17, 1 }
   0x8   : > { %p729_p4 = por %p81_p1, %p80_p0  ;;  %p405_p5 = scmp.ge.s32.totalorder %s671_s15, 1 }
   0x9   : > { %p734_p6 = por %p110_p3, %p80_p0  ;;  %p117_p7 = scmp.lt.s32.totalorder %s671_s15, 3 }
   0xa   : > { %s128_s22 = sshll.u32 %s862_s0, 4  ;;  %s673_s24 = smov [#allocation2]   ;;  %s129_s22 = int_to_ptr.hbm [resolvable:$true] %s128_s22 }
   0xb   : > { %p742_p8 = pnand %p405_p5, %p117_p7  ;;  %s130_s25 = sshll.u32 %s673_s24, 4  ;;  %s131_s25 = int_to_ptr.vmem [resolvable:$true] %s130_s25 }
   0xc   : > { %s142_s28 = sshll.u32 %s863_s1, 4  ;;  %s674_s29 = smov 128   ;;  %s143_s28 = int_to_ptr.hbm [resolvable:$true] %s142_s28 }
   0xd   : > { %p448_p9 = pneg %p742_p8  ;;  %s675_s30 = smov 8  }
   0xe   : > { %s676_s4 = smov [#allocation5]   ;;  %s761_s6 = sadd.s32 1, %s671_s15  }
   0xf   : > { %p449_p10 = pnand %p448_p9, %p81_p1  ;;  %s144_s5 = sshll.u32 %s676_s4, 4  ;;  %s145_s5 = int_to_ptr.vmem [resolvable:$true] %s144_s5 }
  0x10   : > { %s67_s7 = sadd.s32 1, %s667_s14  ;;  %s64_s8 = ssub.s32 %s671_s15, %s761_s6 }
  0x11   : > { %451 = dma.hbm_to_vmem [thread:$0]  (!%p449_p10), %s129_s22, 256, %s131_s25, [#allocation3], %s674_s29, %s674_s29, %s675_s30  }
  0x12   : > { %454 = dma.hbm_to_vmem [thread:$0]  (!%p449_p10), %s143_s28, 1024, %s145_s5, [#allocation6], %s674_s29, %s674_s29, %s675_s30  }
  0x13   : > { %p74_p12 = scmp.ne.s32.totalorder %s667_s14, %s663_s13  ;;  %p65_p13 = scmp.eq.s32.totalorder %s64_s8, 0 }
  0x14   : > { %p75_p0 = scmp.eq.s32.totalorder %s671_s15, 0  ;;  %p465_p7 = scmp.lt.s32.totalorder %s671_s15, 2 }
  0x15   : > { %p771_p3 = por %p104_p2, %p74_p12  ;;  %s158_s11 = sand.u32 1, %s671_s15  }
  0x16   : > { %s776_s10 = scalar_select %p65_p13, %s667_s14, %s67_s7  }
  0x17   : > { %p76_p5 = por %p75_p0, %p74_p12  ;;  %s160_s17 = sand.u32 1, %s667_s14  }
  0x18   : > { %s409_s20 = sshll.u32 %s160_s17, 4  ;;  %s426_s21 = sshll.u32 %s671_s15, 4 }
  0x19   : > { %s167_s25 = scalar_lea.hbm %s864_s2, %s426_s21  ;;  %s162_s27 = scalar_lea.vmem [#allocation7], %s409_s20 }
  0x1a   : > { %s168_s26 = sshll.u32 %s167_s25, 4  ;;  %s170_s28 = sshll.u32 %s162_s27, 4  ;;  %s169_s26 = int_to_ptr.hbm [resolvable:$true] %s168_s26  ;;  %s171_s28 = int_to_ptr.vmem [resolvable:$true] %s170_s28 }
  0x1b   : > { %p785_p2 = pnand %p465_p7, %p76_p5  ;;  %s159_s5 = scalar_lea.sflag [#allocation3], %s158_s11 }
  0x1c   : > { %s567_s7 = sshra.s32 %s169_s26, 4  ;;  %s574_s20 = scalar_lea.hbm %s864_s2, 32  ;;  %s568_s7 = int_to_ptr.hbm [resolvable:$true] %s567_s7 }
  0x1d   : > { %s569_s8 = scalar_lea.hbm %s568_s7, 16  ;;  %p571_p10 = pneg %p785_p2 }
  0x1e   : > { %p570_p9 = scmp.ne.s32.totalorder %s568_s7, %s569_s8  ;;  %p575_p0 = scmp.lt.s32.totalorder %s568_s7, %s864_s2 }
  0x1f   : > { %p576_p5 = scmp.lt.s32.totalorder %s574_s20, %s569_s8 }
  0x20   : > { %p572_p12 = pnand %p571_p10, %p570_p9 }
  0x21   : > { %p577_p7 = por %p576_p5, %p575_p0 }
  0x22   : > { %p573_p13 = pneg %p572_p12 }
  0x24   : > { %p578_p11 = pnand %p577_p7, %p573_p13 }
  0x26   : > { %581 = shalt.err (!%p578_p11)
}
  0x27   : > { %458 = dma.hbm_to_vmem [thread:$0]  (!%p785_p2), %s169_s26, 256, %s171_s28, %s159_s5, %s674_s29, %s674_s29, %s675_s30  }
  0x28   : > { %182 = sbr.rel (%p742_p8) target bundleno = 341 (0x155), region = 32 }
  0x2d   : > { %642 = dma.done.wait (%p81_p1), [#allocation3], 256  }
  0x2e   : > { %644 = vsyncadd (%p81_p1), [#allocation3], 4294967040 }
  0x2f   : > { %646 = dma.done.wait (%p81_p1), [#allocation6], 1024  }
  0x30   : > { %648 = vsyncadd (%p81_p1), [#allocation6], 4294966272  ;;  %s194_s29 = sand.u32 1, %s720_s16   ;;  %s196_s30 = sand.u32 1, %s663_s13  }
  0x31   : > { %s816_s23 = sshll.u32 %s196_s30, 4  ;;  %s195_s11 = scalar_lea.sflag [#allocation3], %s194_s29 }
  0x32   : > { %s198_s25 = scalar_lea.vmem [#allocation7], %s816_s23 }
  0x33   : > { %650 = dma.done.wait (%p729_p4), %s195_s11, 256  }
  0x34   : > { %652 = vsyncadd (%p729_p4), %s195_s11, 4294967040  ;;  %v231_v0 = vld [vmem:[#allocation5 + $0x38] sm:$0xff]  ;;  %v230_v1 = vld [vmem:[#allocation5 + $0x30] sm:$0xff]  ;;  %vm234_vm0 = vcmask 523264   ;;  %vm264_vm1 = vcmask 130048   ;;  %s427_s18 = sshll.u32 %s720_s16, 4 }
  0x35   : > { %428 = vmatpush.msra.mxu2 %v231_v0  ;;  %249 = vmatpush.msra.mxu0 %v231_v0  ;;  %v229_v2 = vld [vmem:[#allocation5 + $0x28] sm:$0xff]  ;;  %v228_v3 = vld [vmem:[#allocation5 + $0x20] sm:$0xff]  ;;  %v227_v4 = vld [vmem:[#allocation5 + $0x18] sm:$0xff]  ;;  %s308_s28 = scalar_lea.hbm %s865_s3, %s427_s18  ;;  %s221_s4 = scalar_lea.vmem [#allocation8], %s816_s23 }
  0x36   : > { %v226_v5 = vld [vmem:[#allocation5 + $0x10] sm:$0xff]  ;;  %v225_v6 = vld [vmem:[#allocation5 + $0x8] sm:$0xff]  ;;  %v224_v7 = vld [vmem:[#allocation5] sm:$0xff]  ;;  %s309_s5 = sshll.u32 %s221_s4, 4  ;;  %s311_s7 = sshll.u32 %s308_s28, 4  ;;  %s310_s5 = int_to_ptr.vmem [resolvable:$true] %s309_s5  ;;  %s312_s7 = int_to_ptr.hbm [resolvable:$true] %s311_s7 }
  0x37   : > { %429 = vmatpush.msra.mxu2 %v230_v1  ;;  %250 = vmatpush.msra.mxu0 %v230_v1  ;;  %v233_v8 = vld [vmem:[%s198_s25 + $0x8] sm:$0xff]  ;;  %v232_v9 = vld [vmem:[%s198_s25] sm:$0xff]  ;;  %s297_s8 = scalar_lea.sflag [#allocation4], %s196_s30  ;;  %s611_s17 = sshra.s32 %s312_s7, 4  ;;  %s612_s17 = int_to_ptr.hbm [resolvable:$true] %s611_s17 }
  0x38   : > { %v222_v12 = vld [vmem:[#allocation2] sm:$0xff]  ;;  %v223_v13 = vld [vmem:[#allocation2 + $0x8] sm:$0xff]  ;;  %s613_s16 = scalar_lea.hbm %s612_s17, 16  ;;  %s617_s22 = scalar_lea.hbm %s865_s3, 32 }
  0x39   : > { %430 = vmatpush.msra.mxu2 %v229_v2  ;;  %251 = vmatpush.msra.mxu0 %v229_v2  ;;  %p614_p1 = scmp.ne.s32.totalorder %s612_s17, %s613_s16  ;;  %p618_p11 = scmp.lt.s32.totalorder %s612_s17, %s865_s3 }
  0x3a   : > { %p619_p2 = scmp.lt.s32.totalorder %s617_s22, %s613_s16 }
  0x3b   : > { %431 = vmatpush.msra.mxu2 %v228_v3  ;;  %252 = vmatpush.msra.mxu0 %v228_v3  ;;  %p615_p4 = pnand %p614_p1, %p771_p3 }
  0x3c   : > { %p620_p9 = por %p619_p2, %p618_p11 }
  0x3d   : > { %432 = vmatpush.msra.mxu2 %v227_v4  ;;  %253 = vmatpush.msra.mxu0 %v227_v4  ;;  %p616_p8 = pneg %p615_p4 }
  0x3f   : > { %433 = vmatpush.msra.mxu2 %v226_v5  ;;  %254 = vmatpush.msra.mxu0 %v226_v5  ;;  %p621_p10 = pnand %p620_p9, %p616_p8 }
  0x41   : > { %434 = vmatpush.msra.mxu2 %v225_v6  ;;  %255 = vmatpush.msra.mxu0 %v225_v6 }
  0x43   : > { %435 = vmatpush.msra.mxu2 %v224_v7  ;;  %256 = vmatpush.msra.mxu0 %v224_v7 }
  0x44   : > { %418 = vmatmul.msk.f32.vlgmr.msra.gmra.mxu2 %vm234_vm0, %v233_v8  ;;  %417 = vmatmul.msk.f32.vlgmr.msra.gmra.mxu0 %vm234_vm0, %v232_v9 }
  0xc1   : > { %v258_v11 = vpop.f32.mrf.mxu0 }
  0xc7   : > { %v261_v10 = vpop.f32.mrf.mxu2 }
  0xc8   : > { %285 = vmatpush.msra.mxu1 %v261_v10 }
  0xca   : > { %286 = vmatpush.msra.mxu1 %v258_v11 }
  0xcb   : > { %419 = vmatmul.msk.f32.vlgmr.msra.gmra.mxu1 %vm264_vm1, %v222_v12 }
  0xd3   : > { %420 = vmatmul.msk.f32.gmra.mxu1 %vm264_vm1, %v223_v13 }
 0x148   : > { %v288_v14 = vpop.f32.mrf.mxu1 }
 0x149   : > { %294 = vst.msk [vmem:[%s221_s4] sm:$0xff] %vm234_vm0, %v288_v14 }
 0x150   : > { %v291_v15 = vpop.f32.mrf.mxu1 }
 0x151   : > { %295 = vst.msk [vmem:[%s221_s4 + $0x8] sm:$0xff] %vm234_vm0, %v291_v15 }
 0x152   : > { %624 = shalt.err (!%p621_p10)
}
 0x153   : > { %s677_s30 = smov 128   ;;  %s678_s23 = smov 8  }
 0x154   : > { %446 = dma.vmem_to_hbm [thread:$0]  (%p771_p3), %s310_s5, 256, %s312_s7, %s297_s8, %s677_s30, %s677_s30, %s678_s23  }
 0x155 PF: > { %s326_s11 = sand.u32 1, %s659_s12   ;;  %p871_p12 = scmp.ge.s32.totalorder %s671_s15, 2 }
 0x156   : > { %s327_s25 = scalar_lea.sflag [#allocation4], %s326_s11 }
 0x157   : > { %p460_p13 = pnand %p871_p12, %p734_p6 }
 0x159   : > { %p461_p0 = pneg %p460_p13 }
 0x15b   : > { %654 = dma.done.wait (%p461_p0), %s327_s25, 256  }
 0x15c   : > { %656 = vsyncadd (%p461_p0), %s327_s25, 4294967040  ;;  %p15_p5 = scmp.ge.s32.totalorder %s761_s6, 4   ;;  %s872_s12 = smov %s663_s13 }
 0x15d   : > { %s873_s13 = smov %s667_s14  ;;  %s874_s14 = smov %s776_s10 }
 0x15e   : > { %s875_s15 = smov %s761_s6  ;;  %17 = sbr.rel (!%p15_p5) target bundleno = 5 (0x5), region = 84 }
 0x163   :  { %333 = vsyncpa [#allocation3], 1 }
 0x164   :  { %335 = vsyncpa [#allocation3 + $0x1], 1 }
 0x165   :  { %336 = vsyncpa [#allocation6], 1 }
 0x166   :  { %337 = vsyncpa [#allocation4], 1 }
 0x167   :  { %339 = vsyncpa [#allocation4 + $0x1], 1 }

</bundles_post_ra>
